<compile_context>
chip_gen: v5e
topology: v5e:2x2
jax: 0.10.0
libtpu: 0.0.40
codegen_flags: <defaults>
</compile_context>

<pallas_src>
import functools

import jax
import jax.numpy as jnp
from jax.experimental import pallas as pl
from jax.experimental.pallas import tpu as pltpu


# ----------------------------- model dims (small, synthetic) ----------------
TRANSFORMER_DIM = 32      # transformer_model.config.hidden_size (D)
PARENT_PROJ = 16          # parent_proj_size (P)
HIDDEN = 32               # hidden_size (H)
CHILD_EMB = 8             # child_num_emb_size (C)
NUM_RULES = 16            # len(rules) + 1 (R)
MAX_NUM_CHILDREN = 10     # (M)
BATCH = 8                 # rows per tree-expansion step (B)

LN_EPS = 1e-5             # nn.LayerNorm default eps

D, P, H, C, R, M, B = (TRANSFORMER_DIM, PARENT_PROJ, HIDDEN, CHILD_EMB,
                       NUM_RULES, MAX_NUM_CHILDREN, BATCH)


def _round_up(n, m):
    return ((n + m - 1) // m) * m


# Fused layer-1 input layout (lanes of the per-step input tile).
R_PAD = _round_up(R, 8)                 # 16  parent one-hot width
M_PAD = _round_up(M, 8)                 # 16  child one-hot width
DCOMB = D + R_PAD + M_PAD               # 64  fused layer-1 input width
IDX_LANES = 8                           # spare lanes carrying f32-encoded ints
DIN = DCOMB + IDX_LANES                 # 72  per-step input lanes
LANE_PIDX = DCOMB                       # parent index lane
LANE_CIDX = DCOMB + 1                   # child-count lane
LANE_LIDX = DCOMB + 2                   # label lane
LOSS_LANE = R                           # spare logits lane carrying the CE loss
assert R <= H and LOSS_LANE < H

# Packed weight slab layout (all sections share last dim = H).
ROW_W1 = 0                              # [DCOMB, H]  fused layer-1: [w1q ; p_tab ; c_tab]
ROW_W2 = ROW_W1 + DCOMB                 # [H, H]      linear2
ROW_YT = ROW_W2 + H                     # [H, H]      (rules@wo+bo).T, lanes >= R zero
ROW_BIAS = ROW_YT + H                   # [8, H]      b1', b2, ln_g, ln_b (+4 pad rows)
SLAB_ROWS = ROW_BIAS + 8                # 136


# ----------------------------- shared math helpers ---------------------------
_SQRT1_2 = 0.7071067811865476


def _erf_approx(x):
    # Abramowitz & Stegun 7.1.26 (max abs err ~1.5e-7).  Uses only exp/mul/add
    # so it lowers cleanly in Mosaic regardless of lax.erf support.
    a1, a2, a3, a4, a5 = (0.254829592, -0.284496736, 1.421413741,
                          -1.453152027, 1.061405429)
    p = 0.3275911
    s = jnp.where(x >= 0.0, 1.0, -1.0)
    z = jnp.abs(x)
    t = 1.0 / (1.0 + p * z)
    poly = t * (a1 + t * (a2 + t * (a3 + t * (a4 + t * a5))))
    return s * (1.0 - poly * jnp.exp(-z * z))


def _gelu_kernel(x):
    # PyTorch F.gelu default = exact erf-based gelu (erf via A&S polynomial).
    return 0.5 * x * (1.0 + _erf_approx(x * _SQRT1_2))


def _gelu_exact(x):
    return 0.5 * x * (1.0 + jax.lax.erf(x * _SQRT1_2))


def _layer_norm(x, gamma, beta):
    mean = jnp.mean(x, axis=-1, keepdims=True)
    var = jnp.mean((x - mean) ** 2, axis=-1, keepdims=True)
    return (x - mean) * jax.lax.rsqrt(var + LN_EPS) * gamma + beta


# ----------------------------- fused per-step kernel -------------------------
def _treegen_step_kernel(x_ref, slab_ref, out_ref, *, compute_loss):
    f32 = jnp.float32
    xin = x_ref[0]                                   # [B, DIN]

    # Carve the resident weight slab (static slices -> cheap VMEM views).
    w1 = slab_ref[ROW_W1:ROW_W1 + DCOMB, :]          # [DCOMB, H]
    w2 = slab_ref[ROW_W2:ROW_W2 + H, :]              # [H, H]
    y_t = slab_ref[ROW_YT:ROW_YT + H, :]             # [H, H] (cols >= R are zero)
    bias = slab_ref[ROW_BIAS:ROW_BIAS + 8, :]        # [8, H]
    b1, b2 = bias[0:1, :], bias[1:2, :]
    ln_g, ln_b = bias[2:3, :], bias[3:4, :]

    # Indices arrive as exact small-integer f32 values in spare lanes.
    p_i = xin[:, LANE_PIDX:LANE_PIDX + 1].astype(jnp.int32)   # [B, 1]
    c_i = xin[:, LANE_CIDX:LANE_CIDX + 1].astype(jnp.int32)   # [B, 1]

    # Build [q | parent_onehot | child_onehot] in place: lanes 0..D-1 already
    # hold q (lanes D..DCOMB-1 are zero), add the two one-hots at their target
    # lane ranges.  This replaces two extra matmuls + a concatenate.
    lane = jax.lax.broadcasted_iota(jnp.int32, (B, DCOMB), 1)
    p_hit = (lane == p_i + D) & (lane < D + R_PAD)
    c_hit = lane == c_i + (D + R_PAD)
    combined = xin[:, :DCOMB] + (p_hit | c_hit).astype(f32)   # [B, DCOMB]

    # linear1 (parent_proj + embedding gathers folded in); dropout = identity.
    x = jnp.dot(combined, w1, preferred_element_type=f32) + b1
    x = _layer_norm(_gelu_kernel(x), ln_g, ln_b)
    # linear2 -> gelu -> layer_norm (same LN params: PyTorch reuses one module).
    x = jnp.dot(x, w2, preferred_element_type=f32) + b2
    x = _layer_norm(_gelu_kernel(x), ln_g, ln_b)

    # predictions = x @ (output_proj(rule_table)).T; lanes >= R are exact zeros.
    logits = jnp.dot(x, y_t, preferred_element_type=f32)      # [B, H]

    if compute_loss:
        l_i = xin[:, LANE_LIDX:LANE_LIDX + 1].astype(jnp.int32)
        col = jax.lax.broadcasted_iota(jnp.int32, (B, H), 1)
        masked = jnp.where(col < R, logits, -1e30)             # exclude pad lanes
        mx = jnp.max(masked, axis=-1, keepdims=True)
        lse = mx + jnp.log(jnp.sum(jnp.exp(masked - mx), axis=-1, keepdims=True))
        label_logit = jnp.sum(jnp.where(col == l_i, logits, 0.0),
                              axis=-1, keepdims=True)
        nll = lse - label_logit                                 # [B, 1]
        loss = jnp.sum(nll, axis=0, keepdims=True) * (1.0 / B)  # [1, 1]
        # Stash the scalar loss in spare lane LOSS_LANE of the (already full
        # lane-width) logits tile -> no extra output / scalar store needed.
        out_ref[0] = jnp.where(col == LOSS_LANE, loss, logits)
    else:
        out_ref[0] = logits


def treegen_head_pallas(x_in, packed_slab, *, compute_loss):
    """One gridded pallas_call over T stacked tree-expansion steps."""
    T = x_in.shape[0]
    kernel = functools.partial(_treegen_step_kernel, compute_loss=compute_loss)
    return pl.pallas_call(
        kernel,
        out_shape=jax.ShapeDtypeStruct((T, B, H), jnp.float32),
        grid=(T,),
        in_specs=[
            pl.BlockSpec((1, B, DIN), lambda t: (t, 0, 0)),
            # Constant index_map -> slab stays resident, no re-DMA after step 0.
            pl.BlockSpec((SLAB_ROWS, H), lambda t: (0, 0)),
        ],
        out_specs=pl.BlockSpec((1, B, H), lambda t: (t, 0, 0)),
        compiler_params=pltpu.CompilerParams(
            dimension_semantics=("parallel",)),   # uses v7x's 2nd TC; no-op on v5e/v6e
    )(x_in, packed_slab)


# ----------------------------- parameter construction ------------------------
def init_params(key):
    """Deterministic synthetic parameters matching the PyTorch module shapes."""
    ks = jax.random.split(key, 12)

    def lin(k, fan_in, shape):
        return (jax.random.normal(k, shape, jnp.float32) / jnp.sqrt(fan_in)
                ).astype(jnp.float32)

    rule_table = jax.random.normal(ks[0], (R, D), jnp.float32)     # rule_embeddings
    child_table = jax.random.normal(ks[1], (M, C), jnp.float32)    # child_num_embeddings

    w1_full = lin(ks[4], D + P + C, (D + P + C, H))                # Linear(D+P+C -> H)
    params = {
        "wp": lin(ks[2], D, (D, P)),                 # parent_proj weight ([in,out])
        "bp": jnp.zeros((1, P), jnp.float32),
        "w1q": w1_full[:D, :],                       # linear1 slice on q_emb
        "w1p": w1_full[D:D + P, :],                  # linear1 slice on parent proj
        "w1c": w1_full[D + P:, :],                   # linear1 slice on child emb
        "b1": 0.01 * jax.random.normal(ks[5], (1, H), jnp.float32),
        "w2": lin(ks[6], H, (H, H)),                 # linear2
        "b2": 0.01 * jax.random.normal(ks[7], (1, H), jnp.float32),
        "ln_g": jnp.ones((1, H), jnp.float32),       # shared nn.LayerNorm
        "ln_b": jnp.zeros((1, H), jnp.float32),
        "wo": lin(ks[8], D, (D, H)),                 # output_proj
        "bo": 0.01 * jax.random.normal(ks[9], (1, H), jnp.float32),
    }
    return rule_table, child_table, params


def pack_params(rule_table, child_table, params):
    """One-time, batch-independent precompute + packing into a single slab."""
    dot = functools.partial(jnp.dot, precision=jax.lax.Precision.HIGHEST)
    # Fold parent_proj into linear1.
    w1p_eff = dot(params["wp"], params["w1p"])                     # [D, H]
    b1_eff = params["b1"] + dot(params["bp"], params["w1p"])       # [1, H]
    # Fold embedding gathers into per-index contribution tables.
    p_tab = dot(rule_table, w1p_eff)                               # [R, H]
    c_tab = dot(child_table, params["w1c"])                        # [M, H]
    # Hoist output projection (tied output embeddings = rule table).
    y = dot(rule_table, params["wo"]) + params["bo"]               # [R, H]
    y_t = jnp.pad(y.T, ((0, 0), (0, H - R)))                       # [H, H]

    def pad_rows(a, n):
        return jnp.pad(a, ((0, n - a.shape[0]), (0, 0)))

    w1_comb = jnp.concatenate(
        [params["w1q"], pad_rows(p_tab, R_PAD), pad_rows(c_tab, M_PAD)], axis=0)
    bias_block = jnp.concatenate(
        [b1_eff, params["b2"], params["ln_g"], params["ln_b"]], axis=0)

    slab = jnp.concatenate([
        w1_comb,                      # ROW_W1   [64, H]
        params["w2"],                 # ROW_W2   [H, H]
        y_t,                          # ROW_YT   [H, H]
        pad_rows(bias_block, 8),      # ROW_BIAS [8, H]
    ], axis=0).astype(jnp.float32)
    assert slab.shape == (SLAB_ROWS, H)
    return slab


# ----------------------------- forward (module semantics) --------------------
def transformer_tree_generator_forward(question_emb, parent_inds, child_nums,
                                       packed_slab, labels=None):
    """Mirrors TransfomerTreeGenerator.forward (solve mode, question_emb given,
    tie_embeddings=True, eval-mode dropout).  Accepts either one step
    ([B, D] / [B] inputs -> returns scalars like the module) or T stacked steps
    ([T, B, D] / [T, B]) which run as a single gridded pallas_call."""
    single = question_emb.ndim == 2
    if single:
        question_emb = question_emb[None]
        parent_inds = parent_inds[None]
        child_nums = child_nums[None]
        if labels is not None:
            labels = labels[None]
    assert question_emb.shape[-1] == D and question_emb.shape[-2] == B

    lab = labels if labels is not None else jnp.zeros_like(parent_inds)
    # Per-step input slab: [q (D) | zeros (one-hot slots) | p,c,l as f32 | pad].
    q_pad = jnp.pad(question_emb.astype(jnp.float32),
                    ((0, 0), (0, 0), (0, DCOMB - D)))
    idx_f = jnp.stack([parent_inds, child_nums, lab], axis=-1).astype(jnp.float32)
    idx_f = jnp.pad(idx_f, ((0, 0), (0, 0), (0, IDX_LANES - 3)))
    x_in = jnp.concatenate([q_pad, idx_f], axis=-1)                # [T, B, DIN]

    out = treegen_head_pallas(x_in, packed_slab,
                              compute_loss=labels is not None)     # [T, B, H]
    preds = out[:, :, :R]
    if labels is not None:
        loss = out[:, 0, LOSS_LANE]                                # [T]
        if single:
            return loss[0], preds[0]
        return loss, preds
    if single:
        return (preds[0],)
    return (preds,)


# ----------------------------- pure-JAX reference ----------------------------
def reference_forward(question_emb, parent_inds, child_nums, rule_table,
                      child_table, params, labels=None):
    dot = functools.partial(jnp.dot, precision=jax.lax.Precision.HIGHEST)
    pe = rule_table[parent_inds]
    ce = child_table[child_nums]
    parent = dot(pe, params["wp"]) + params["bp"]
    x = (dot(question_emb, params["w1q"]) + dot(parent, params["w1p"])
         + dot(ce, params["w1c"]) + params["b1"])
    x = _layer_norm(_gelu_exact(x), params["ln_g"], params["ln_b"])
    x = dot(x, params["w2"]) + params["b2"]
    x = _layer_norm(_gelu_exact(x), params["ln_g"], params["ln_b"])
    y = dot(rule_table, params["wo"]) + params["bo"]
    preds = dot(x, y.T)
    if labels is None:
        return (preds,)
    lse = jax.nn.logsumexp(preds, axis=-1)
    nll = lse - jnp.take_along_axis(preds, labels[:, None], axis=-1)[:, 0]
    return jnp.mean(nll), preds


if __name__ == "__main__":
    key = jax.random.PRNGKey(0)
    k_param, k_q, k_p, k_c, k_l = jax.random.split(key, 5)

    rule_table, child_table, params = init_params(k_param)
    packed_slab = pack_params(rule_table, child_table, params)   # one-time

    T = 4  # stacked tree-expansion steps batched into one gridded kernel call
    question_emb = jax.random.normal(k_q, (T, B, D), jnp.float32)
    parent_inds = jax.random.randint(k_p, (T, B), 0, R)
    child_nums = jax.random.randint(k_c, (T, B), 0, M)
    labels = jax.random.randint(k_l, (T, B), 0, R)

    fwd = jax.jit(transformer_tree_generator_forward)

    loss, preds = fwd(question_emb, parent_inds, child_nums, packed_slab,
                      labels=labels)
    (preds_only,) = fwd(question_emb, parent_inds, child_nums, packed_slab)
    # Single-step call path (module-exact return shapes).
    loss1, preds1 = fwd(question_emb[0], parent_inds[0], child_nums[0],
                        packed_slab, labels=labels[0])
    jax.block_until_ready((loss, preds, preds_only, loss1, preds1))

    # Validate against the un-folded pure-JAX reference.  Tolerances leave
    # headroom for (a) the changed f32 rounding order from weight folding and
    # (b) possible bf16-pass MXU rounding at default matmul precision; real
    # algebra/indexing bugs would produce O(1) errors and still be caught, and
    # the Frobenius-norm check tightens this to ~2% overall.
    TOL = dict(atol=1.5e-1, rtol=5e-2)
    ref_losses, ref_preds = [], []
    for t in range(T):
        rl, rp = reference_forward(question_emb[t], parent_inds[t],
                                   child_nums[t], rule_table, child_table,
                                   params, labels=labels[t])
        ref_losses.append(rl)
        ref_preds.append(rp)
    ref_losses = jnp.stack(ref_losses)
    ref_preds = jnp.stack(ref_preds)

    assert preds.shape == (T, B, R) and preds.dtype == jnp.float32
    assert preds_only.shape == (T, B, R)
    assert bool(jnp.all(jnp.isfinite(preds))) and bool(jnp.all(jnp.isfinite(loss)))
    assert jnp.allclose(preds, ref_preds, **TOL)
    assert jnp.allclose(preds_only, ref_preds, **TOL)
    assert jnp.allclose(loss, ref_losses, **TOL)
    rel = jnp.linalg.norm(preds - ref_preds) / jnp.linalg.norm(ref_preds)
    assert float(rel) < 2e-2
    assert preds1.shape == (B, R)
    assert jnp.allclose(preds1, ref_preds[0], **TOL)
    assert jnp.allclose(loss1, ref_losses[0], **TOL)
    print("KERNEL_OK")
</pallas_src>

<mosaic_0001>
module attributes {stable_mosaic.version = 11 : i64} {
  func.func @_treegen_step_kernel(%arg0: i32, %arg1: memref<1x8x72xf32, #tpu.memory_space<vmem>>, %arg2: memref<136x32xf32, #tpu.memory_space<vmem>>, %arg3: memref<1x8x32xf32, #tpu.memory_space<vmem>>) attributes {dimension_semantics = [#tpu.dimension_semantics<parallel>], iteration_bounds = array<i64: 4>, scalar_prefetch = 0 : i64, scratch_operands = 0 : i64, tpu.core_type = #tpu.core_type<tc>, window_params = [{transform_indices = @transform_0, window_bounds = array<i64: 1, 8, 72>}, {pipeline_mode = #tpu.pipeline_mode<synchronous>, transform_indices = @transform_1, window_bounds = array<i64: 136, 32>}, {transform_indices = @transform_2, window_bounds = array<i64: 1, 8, 32>}]} {
    %c0 = arith.constant 0 : index
    %c0_0 = arith.constant 0 : index
    %c0_1 = arith.constant 0 : index
    %0 = vector.load %arg1[%c0, %c0_0, %c0_1] : memref<1x8x72xf32, #tpu.memory_space<vmem>>, vector<1x8x72xf32>
    %1 = vector.shape_cast %0 : vector<1x8x72xf32> to vector<8x72xf32>
    %c0_2 = arith.constant 0 : index
    %c0_3 = arith.constant 0 : index
    %2 = vector.load %arg2[%c0_2, %c0_3] : memref<136x32xf32, #tpu.memory_space<vmem>>, vector<64x32xf32>
    %c64 = arith.constant 64 : index
    %c0_4 = arith.constant 0 : index
    %3 = vector.load %arg2[%c64, %c0_4] : memref<136x32xf32, #tpu.memory_space<vmem>>, vector<32x32xf32>
    %c96 = arith.constant 96 : index
    %c0_5 = arith.constant 0 : index
    %4 = vector.load %arg2[%c96, %c0_5] : memref<136x32xf32, #tpu.memory_space<vmem>>, vector<32x32xf32>
    %c128 = arith.constant 128 : index
    %c0_6 = arith.constant 0 : index
    %5 = vector.load %arg2[%c128, %c0_6] : memref<136x32xf32, #tpu.memory_space<vmem>>, vector<8x32xf32>
    %6 = vector.extract_strided_slice %5 {offsets = [0, 0], sizes = [1, 32], strides = [1, 1]} : vector<8x32xf32> to vector<1x32xf32>
    %7 = vector.extract_strided_slice %5 {offsets = [1, 0], sizes = [1, 32], strides = [1, 1]} : vector<8x32xf32> to vector<1x32xf32>
    %8 = vector.extract_strided_slice %5 {offsets = [2, 0], sizes = [1, 32], strides = [1, 1]} : vector<8x32xf32> to vector<1x32xf32>
    %9 = vector.extract_strided_slice %5 {offsets = [3, 0], sizes = [1, 32], strides = [1, 1]} : vector<8x32xf32> to vector<1x32xf32>
    %10 = vector.extract_strided_slice %1 {offsets = [0, 64], sizes = [8, 1], strides = [1, 1]} : vector<8x72xf32> to vector<8x1xf32>
    %11 = arith.fptosi %10 : vector<8x1xf32> to vector<8x1xi32>
    %12 = vector.extract_strided_slice %1 {offsets = [0, 65], sizes = [8, 1], strides = [1, 1]} : vector<8x72xf32> to vector<8x1xf32>
    %13 = arith.fptosi %12 : vector<8x1xf32> to vector<8x1xi32>
    %14 = tpu.iota {dimensions = array<i32: 1>} : vector<8x64xi32>
    %c32_i32 = arith.constant 32 : i32
    %15 = vector.broadcast %c32_i32 : i32 to vector<8x1xi32>
    %16 = arith.addi %11, %15 : vector<8x1xi32>
    %17 = vector.broadcast %16 : vector<8x1xi32> to vector<8x64xi32>
    %18 = arith.cmpi eq, %14, %17 : vector<8x64xi32>
    %c48_i32 = arith.constant 48 : i32
    %19 = vector.broadcast %c48_i32 : i32 to vector<8x64xi32>
    %20 = arith.cmpi slt, %14, %19 : vector<8x64xi32>
    %21 = arith.andi %18, %20 : vector<8x64xi1>
    %c48_i32_7 = arith.constant 48 : i32
    %22 = vector.broadcast %c48_i32_7 : i32 to vector<8x1xi32>
    %23 = arith.addi %13, %22 : vector<8x1xi32>
    %24 = vector.broadcast %23 : vector<8x1xi32> to vector<8x64xi32>
    %25 = arith.cmpi eq, %14, %24 : vector<8x64xi32>
    %26 = vector.extract_strided_slice %1 {offsets = [0, 0], sizes = [8, 64], strides = [1, 1]} : vector<8x72xf32> to vector<8x64xf32>
    %27 = arith.ori %21, %25 : vector<8x64xi1>
    %28 = arith.extui %27 : vector<8x64xi1> to vector<8x64xi32>
    %29 = arith.sitofp %28 : vector<8x64xi32> to vector<8x64xf32>
    %30 = arith.addf %26, %29 : vector<8x64xf32>
    %cst = arith.constant dense<0.000000e+00> : vector<8x32xf32>
    %31 = tpu.matmul %30, %2, %cst {dimension_numbers = #tpu.dot_dimension_numbers<[1], [0], [0], [1], [0, 0, 1, 1], [], []>} : vector<8x64xf32>, vector<64x32xf32>, vector<8x32xf32> -> vector<8x32xf32>
    %32 = vector.broadcast %6 : vector<1x32xf32> to vector<8x32xf32>
    %33 = arith.addf %31, %32 : vector<8x32xf32>
    %cst_8 = arith.constant 5.000000e-01 : f32
    %34 = vector.broadcast %cst_8 : f32 to vector<8x32xf32>
    %35 = arith.mulf %34, %33 : vector<8x32xf32>
    %cst_9 = arith.constant 0.707106769 : f32
    %36 = vector.broadcast %cst_9 : f32 to vector<8x32xf32>
    %37 = arith.mulf %33, %36 : vector<8x32xf32>
    %cst_10 = arith.constant 0.000000e+00 : f32
    %38 = vector.broadcast %cst_10 : f32 to vector<8x32xf32>
    %39 = arith.cmpf oge, %37, %38 : vector<8x32xf32>
    %cst_11 = arith.constant 1.000000e+00 : f32
    %cst_12 = arith.constant -1.000000e+00 : f32
    %40 = vector.broadcast %cst_11 : f32 to vector<8x32xf32>
    %41 = vector.broadcast %cst_12 : f32 to vector<8x32xf32>
    %42 = arith.select %39, %40, %41 : vector<8x32xi1>, vector<8x32xf32>
    %43 = math.absf %37 : vector<8x32xf32>
    %cst_13 = arith.constant 0.327591091 : f32
    %44 = vector.broadcast %cst_13 : f32 to vector<8x32xf32>
    %45 = arith.mulf %44, %43 : vector<8x32xf32>
    %cst_14 = arith.constant 1.000000e+00 : f32
    %46 = vector.broadcast %cst_14 : f32 to vector<8x32xf32>
    %47 = arith.addf %46, %45 : vector<8x32xf32>
    %cst_15 = arith.constant 1.000000e+00 : f32
    %48 = vector.broadcast %cst_15 : f32 to vector<8x32xf32>
    %49 = arith.divf %48, %47 : vector<8x32xf32>
    %cst_16 = arith.constant 1.06140542 : f32
    %50 = vector.broadcast %cst_16 : f32 to vector<8x32xf32>
    %51 = arith.mulf %49, %50 : vector<8x32xf32>
    %cst_17 = arith.constant -1.45315206 : f32
    %52 = vector.broadcast %cst_17 : f32 to vector<8x32xf32>
    %53 = arith.addf %52, %51 : vector<8x32xf32>
    %54 = arith.mulf %49, %53 : vector<8x32xf32>
    %cst_18 = arith.constant 1.42141378 : f32
    %55 = vector.broadcast %cst_18 : f32 to vector<8x32xf32>
    %56 = arith.addf %55, %54 : vector<8x32xf32>
    %57 = arith.mulf %49, %56 : vector<8x32xf32>
    %cst_19 = arith.constant -0.284496725 : f32
    %58 = vector.broadcast %cst_19 : f32 to vector<8x32xf32>
    %59 = arith.addf %58, %57 : vector<8x32xf32>
    %60 = arith.mulf %49, %59 : vector<8x32xf32>
    %cst_20 = arith.constant 0.254829586 : f32
    %61 = vector.broadcast %cst_20 : f32 to vector<8x32xf32>
    %62 = arith.addf %61, %60 : vector<8x32xf32>
    %63 = arith.mulf %49, %62 : vector<8x32xf32>
    %cst_21 = arith.constant 0.000000e+00 : f32
    %64 = vector.broadcast %cst_21 : f32 to vector<8x32xf32>
    %65 = arith.subf %64, %43 : vector<8x32xf32>
    %66 = arith.mulf %65, %43 : vector<8x32xf32>
    %67 = math.exp %66 : vector<8x32xf32>
    %68 = arith.mulf %63, %67 : vector<8x32xf32>
    %cst_22 = arith.constant 1.000000e+00 : f32
    %69 = vector.broadcast %cst_22 : f32 to vector<8x32xf32>
    %70 = arith.subf %69, %68 : vector<8x32xf32>
    %71 = arith.mulf %42, %70 : vector<8x32xf32>
    %cst_23 = arith.constant 1.000000e+00 : f32
    %72 = vector.broadcast %cst_23 : f32 to vector<8x32xf32>
    %73 = arith.addf %72, %71 : vector<8x32xf32>
    %74 = arith.mulf %35, %73 : vector<8x32xf32>
    %cst_24 = arith.constant dense<0.000000e+00> : vector<8xf32>
    %75 = vector.multi_reduction <add>, %74, %cst_24 [1] : vector<8x32xf32> to vector<8xf32>
    %76 = vector.shape_cast %75 : vector<8xf32> to vector<8x1xf32>
    %cst_25 = arith.constant 3.200000e+01 : f32
    %77 = vector.broadcast %cst_25 : f32 to vector<8x1xf32>
    %78 = arith.divf %76, %77 : vector<8x1xf32>
    %79 = vector.broadcast %78 : vector<8x1xf32> to vector<8x32xf32>
    %80 = arith.subf %74, %79 : vector<8x32xf32>
    %81 = arith.mulf %80, %80 : vector<8x32xf32>
    %cst_26 = arith.constant dense<0.000000e+00> : vector<8xf32>
    %82 = vector.multi_reduction <add>, %81, %cst_26 [1] : vector<8x32xf32> to vector<8xf32>
    %83 = vector.shape_cast %82 : vector<8xf32> to vector<8x1xf32>
    %cst_27 = arith.constant 3.200000e+01 : f32
    %84 = vector.broadcast %cst_27 : f32 to vector<8x1xf32>
    %85 = arith.divf %83, %84 : vector<8x1xf32>
    %86 = vector.broadcast %78 : vector<8x1xf32> to vector<8x32xf32>
    %87 = arith.subf %74, %86 : vector<8x32xf32>
    %cst_28 = arith.constant 9.99999974E-6 : f32
    %88 = vector.broadcast %cst_28 : f32 to vector<8x1xf32>
    %89 = arith.addf %85, %88 : vector<8x1xf32>
    %90 = math.rsqrt %89 : vector<8x1xf32>
    %91 = vector.broadcast %90 : vector<8x1xf32> to vector<8x32xf32>
    %92 = arith.mulf %87, %91 : vector<8x32xf32>
    %93 = vector.broadcast %8 : vector<1x32xf32> to vector<8x32xf32>
    %94 = arith.mulf %92, %93 : vector<8x32xf32>
    %95 = vector.broadcast %9 : vector<1x32xf32> to vector<8x32xf32>
    %96 = arith.addf %94, %95 : vector<8x32xf32>
    %cst_29 = arith.constant dense<0.000000e+00> : vector<8x32xf32>
    %97 = tpu.matmul %96, %3, %cst_29 {dimension_numbers = #tpu.dot_dimension_numbers<[1], [0], [0], [1], [0, 0, 1, 1], [], []>} : vector<8x32xf32>, vector<32x32xf32>, vector<8x32xf32> -> vector<8x32xf32>
    %98 = vector.broadcast %7 : vector<1x32xf32> to vector<8x32xf32>
    %99 = arith.addf %97, %98 : vector<8x32xf32>
    %cst_30 = arith.constant 5.000000e-01 : f32
    %100 = vector.broadcast %cst_30 : f32 to vector<8x32xf32>
    %101 = arith.mulf %100, %99 : vector<8x32xf32>
    %cst_31 = arith.constant 0.707106769 : f32
    %102 = vector.broadcast %cst_31 : f32 to vector<8x32xf32>
    %103 = arith.mulf %99, %102 : vector<8x32xf32>
    %cst_32 = arith.constant 0.000000e+00 : f32
    %104 = vector.broadcast %cst_32 : f32 to vector<8x32xf32>
    %105 = arith.cmpf oge, %103, %104 : vector<8x32xf32>
    %cst_33 = arith.constant 1.000000e+00 : f32
    %cst_34 = arith.constant -1.000000e+00 : f32
    %106 = vector.broadcast %cst_33 : f32 to vector<8x32xf32>
    %107 = vector.broadcast %cst_34 : f32 to vector<8x32xf32>
    %108 = arith.select %105, %106, %107 : vector<8x32xi1>, vector<8x32xf32>
    %109 = math.absf %103 : vector<8x32xf32>
    %cst_35 = arith.constant 0.327591091 : f32
    %110 = vector.broadcast %cst_35 : f32 to vector<8x32xf32>
    %111 = arith.mulf %110, %109 : vector<8x32xf32>
    %cst_36 = arith.constant 1.000000e+00 : f32
    %112 = vector.broadcast %cst_36 : f32 to vector<8x32xf32>
    %113 = arith.addf %112, %111 : vector<8x32xf32>
    %cst_37 = arith.constant 1.000000e+00 : f32
    %114 = vector.broadcast %cst_37 : f32 to vector<8x32xf32>
    %115 = arith.divf %114, %113 : vector<8x32xf32>
    %cst_38 = arith.constant 1.06140542 : f32
    %116 = vector.broadcast %cst_38 : f32 to vector<8x32xf32>
    %117 = arith.mulf %115, %116 : vector<8x32xf32>
    %cst_39 = arith.constant -1.45315206 : f32
    %118 = vector.broadcast %cst_39 : f32 to vector<8x32xf32>
    %119 = arith.addf %118, %117 : vector<8x32xf32>
    %120 = arith.mulf %115, %119 : vector<8x32xf32>
    %cst_40 = arith.constant 1.42141378 : f32
    %121 = vector.broadcast %cst_40 : f32 to vector<8x32xf32>
    %122 = arith.addf %121, %120 : vector<8x32xf32>
    %123 = arith.mulf %115, %122 : vector<8x32xf32>
    %cst_41 = arith.constant -0.284496725 : f32
    %124 = vector.broadcast %cst_41 : f32 to vector<8x32xf32>
    %125 = arith.addf %124, %123 : vector<8x32xf32>
    %126 = arith.mulf %115, %125 : vector<8x32xf32>
    %cst_42 = arith.constant 0.254829586 : f32
    %127 = vector.broadcast %cst_42 : f32 to vector<8x32xf32>
    %128 = arith.addf %127, %126 : vector<8x32xf32>
    %129 = arith.mulf %115, %128 : vector<8x32xf32>
    %cst_43 = arith.constant 0.000000e+00 : f32
    %130 = vector.broadcast %cst_43 : f32 to vector<8x32xf32>
    %131 = arith.subf %130, %109 : vector<8x32xf32>
    %132 = arith.mulf %131, %109 : vector<8x32xf32>
    %133 = math.exp %132 : vector<8x32xf32>
    %134 = arith.mulf %129, %133 : vector<8x32xf32>
    %cst_44 = arith.constant 1.000000e+00 : f32
    %135 = vector.broadcast %cst_44 : f32 to vector<8x32xf32>
    %136 = arith.subf %135, %134 : vector<8x32xf32>
    %137 = arith.mulf %108, %136 : vector<8x32xf32>
    %cst_45 = arith.constant 1.000000e+00 : f32
    %138 = vector.broadcast %cst_45 : f32 to vector<8x32xf32>
    %139 = arith.addf %138, %137 : vector<8x32xf32>
    %140 = arith.mulf %101, %139 : vector<8x32xf32>
    %cst_46 = arith.constant dense<0.000000e+00> : vector<8xf32>
    %141 = vector.multi_reduction <add>, %140, %cst_46 [1] : vector<8x32xf32> to vector<8xf32>
    %142 = vector.shape_cast %141 : vector<8xf32> to vector<8x1xf32>
    %cst_47 = arith.constant 3.200000e+01 : f32
    %143 = vector.broadcast %cst_47 : f32 to vector<8x1xf32>
    %144 = arith.divf %142, %143 : vector<8x1xf32>
    %145 = vector.broadcast %144 : vector<8x1xf32> to vector<8x32xf32>
    %146 = arith.subf %140, %145 : vector<8x32xf32>
    %147 = arith.mulf %146, %146 : vector<8x32xf32>
    %cst_48 = arith.constant dense<0.000000e+00> : vector<8xf32>
    %148 = vector.multi_reduction <add>, %147, %cst_48 [1] : vector<8x32xf32> to vector<8xf32>
    %149 = vector.shape_cast %148 : vector<8xf32> to vector<8x1xf32>
    %cst_49 = arith.constant 3.200000e+01 : f32
    %150 = vector.broadcast %cst_49 : f32 to vector<8x1xf32>
    %151 = arith.divf %149, %150 : vector<8x1xf32>
    %152 = vector.broadcast %144 : vector<8x1xf32> to vector<8x32xf32>
    %153 = arith.subf %140, %152 : vector<8x32xf32>
    %cst_50 = arith.constant 9.99999974E-6 : f32
    %154 = vector.broadcast %cst_50 : f32 to vector<8x1xf32>
    %155 = arith.addf %151, %154 : vector<8x1xf32>
    %156 = math.rsqrt %155 : vector<8x1xf32>
    %157 = vector.broadcast %156 : vector<8x1xf32> to vector<8x32xf32>
    %158 = arith.mulf %153, %157 : vector<8x32xf32>
    %159 = vector.broadcast %8 : vector<1x32xf32> to vector<8x32xf32>
    %160 = arith.mulf %158, %159 : vector<8x32xf32>
    %161 = vector.broadcast %9 : vector<1x32xf32> to vector<8x32xf32>
    %162 = arith.addf %160, %161 : vector<8x32xf32>
    %cst_51 = arith.constant dense<0.000000e+00> : vector<8x32xf32>
    %163 = tpu.matmul %162, %4, %cst_51 {dimension_numbers = #tpu.dot_dimension_numbers<[1], [0], [0], [1], [0, 0, 1, 1], [], []>} : vector<8x32xf32>, vector<32x32xf32>, vector<8x32xf32> -> vector<8x32xf32>
    %164 = vector.extract_strided_slice %1 {offsets = [0, 66], sizes = [8, 1], strides = [1, 1]} : vector<8x72xf32> to vector<8x1xf32>
    %165 = arith.fptosi %164 : vector<8x1xf32> to vector<8x1xi32>
    %166 = tpu.iota {dimensions = array<i32: 1>} : vector<8x32xi32>
    %c16_i32 = arith.constant 16 : i32
    %167 = vector.broadcast %c16_i32 : i32 to vector<8x32xi32>
    %168 = arith.cmpi slt, %166, %167 : vector<8x32xi32>
    %cst_52 = arith.constant -1.000000e+30 : f32
    %169 = vector.broadcast %cst_52 : f32 to vector<8x32xf32>
    %170 = arith.select %168, %163, %169 : vector<8x32xi1>, vector<8x32xf32>
    %cst_53 = arith.constant dense<0xFF800000> : vector<8xf32>
    %171 = vector.multi_reduction <maximumf>, %170, %cst_53 [1] : vector<8x32xf32> to vector<8xf32>
    %172 = vector.shape_cast %171 : vector<8xf32> to vector<8x1xf32>
    %173 = vector.broadcast %172 : vector<8x1xf32> to vector<8x32xf32>
    %174 = arith.subf %170, %173 : vector<8x32xf32>
    %175 = math.exp %174 : vector<8x32xf32>
    %cst_54 = arith.constant dense<0.000000e+00> : vector<8xf32>
    %176 = vector.multi_reduction <add>, %175, %cst_54 [1] : vector<8x32xf32> to vector<8xf32>
    %177 = vector.shape_cast %176 : vector<8xf32> to vector<8x1xf32>
    %178 = math.log %177 : vector<8x1xf32>
    %179 = arith.addf %172, %178 : vector<8x1xf32>
    %180 = vector.broadcast %165 : vector<8x1xi32> to vector<8x32xi32>
    %181 = arith.cmpi eq, %166, %180 : vector<8x32xi32>
    %cst_55 = arith.constant 0.000000e+00 : f32
    %182 = vector.broadcast %cst_55 : f32 to vector<8x32xf32>
    %183 = arith.select %181, %163, %182 : vector<8x32xi1>, vector<8x32xf32>
    %cst_56 = arith.constant dense<0.000000e+00> : vector<8xf32>
    %184 = vector.multi_reduction <add>, %183, %cst_56 [1] : vector<8x32xf32> to vector<8xf32>
    %185 = vector.shape_cast %184 : vector<8xf32> to vector<8x1xf32>
    %186 = arith.subf %179, %185 : vector<8x1xf32>
    %cst_57 = arith.constant dense<0.000000e+00> : vector<1xf32>
    %187 = vector.multi_reduction <add>, %186, %cst_57 [0] : vector<8x1xf32> to vector<1xf32>
    %188 = vector.shape_cast %187 : vector<1xf32> to vector<1x1xf32>
    %cst_58 = arith.constant 1.250000e-01 : f32
    %189 = vector.broadcast %cst_58 : f32 to vector<1x1xf32>
    %190 = arith.mulf %188, %189 : vector<1x1xf32>
    %c16_i32_59 = arith.constant 16 : i32
    %191 = vector.broadcast %c16_i32_59 : i32 to vector<8x32xi32>
    %192 = arith.cmpi eq, %166, %191 : vector<8x32xi32>
    %193 = vector.shape_cast %190 : vector<1x1xf32> to vector<1x1xf32>
    %194 = vector.broadcast %193 : vector<1x1xf32> to vector<8x32xf32>
    %195 = arith.select %192, %194, %163 : vector<8x32xi1>, vector<8x32xf32>
    %c0_60 = arith.constant 0 : index
    %c0_61 = arith.constant 0 : index
    %c0_62 = arith.constant 0 : index
    %196 = vector.load %arg3[%c0_60, %c0_61, %c0_62] : memref<1x8x32xf32, #tpu.memory_space<vmem>>, vector<1x8x32xf32>
    %197 = vector.shape_cast %196 : vector<1x8x32xf32> to vector<8x32xf32>
    %198 = vector.shape_cast %195 : vector<8x32xf32> to vector<1x8x32xf32>
    tpu.vector_store %arg3[%c0_60, %c0_61, %c0_62], %198 {strides = array<i32>} : memref<1x8x32xf32, #tpu.memory_space<vmem>>, vector<1x8x32xf32>,
    return
  }
  func.func @transform_0(%arg0: i32) -> (i32, i32, i32) {
    %c0_i32 = arith.constant 0 : i32
    %c0_i32_0 = arith.constant 0 : i32
    %c0_i32_1 = arith.constant 0 : i32
    return %arg0, %c0_i32, %c0_i32_0 : i32, i32, i32
  }
  func.func @transform_1(%arg0: i32) -> (i32, i32) {
    %c0_i32 = arith.constant 0 : i32
    %c0_i32_0 = arith.constant 0 : i32
    %c0_i32_1 = arith.constant 0 : i32
    return %c0_i32, %c0_i32_0 : i32, i32
  }
  func.func @transform_2(%arg0: i32) -> (i32, i32, i32) {
    %c0_i32 = arith.constant 0 : i32
    %c0_i32_0 = arith.constant 0 : i32
    %c0_i32_1 = arith.constant 0 : i32
    return %arg0, %c0_i32, %c0_i32_0 : i32, i32, i32
  }
}

</mosaic_0001>

<bundles_post_ra>
// kernel: transformer_tree_generator_forward.1
= control target key start
LH: loop header
LB: loop body
LE: loop exit
PB: predicated region body
PF: predicated region fallthrough
CT: control target
= control target key end

     0   :  { %s555_s9 = smov 0   ;;  %s675_s0 = inlined_call_operand.vmem [shape: f32[4,8,72], index: 0, kind: input, shape index: {}]   ;;  %s676_s1 = inlined_call_operand.vmem [shape: f32[136,32], index: 1, kind: input, shape index: {}]   ;;  %s677_s2 = inlined_call_operand.vmem [shape: f32[4,8,32], index: 2, kind: output, shape index: {}]  }
   0x1 LB: > { %s472_s10 = sadd.s32 4294967295, %s532_s9   ;;  %p476_p0 = scmp.ge.s32.totalorder %s532_s9, 1  ;;  %s532_s9 = sphi %s555_s9, %s12_s9  }
   0x2   : > { %p111_p1 = scmp.lt.s32.totalorder %s532_s9, 5 }
   0x4   : > { %p112_p2 = pnand %p476_p0, %p111_p1 }
   0x5   : > { %p131_p3 = scmp.lt.s32.totalorder (!%p112_p2), %s472_s10, 3 }
   0x6   : > { %115 = sbr.rel (%p112_p2) target bundleno = 1456 (0x5b0), region = 28 }
   0xb   : > { %v147_v0 = vld [vmem:[%s676_s1 + $0x38] sm:$0xff]  ;;  %v534_v1 = vmov 64   ;;  %s679_s10 = smov (!%p131_p3, %s472_s10), 3  ;;  %v535_v9 = vmov 65   ;;  %v146_v10 = vld [vmem:[%s676_s1 + $0x30] sm:$0xff]  ;;  %v145_v11 = vld [vmem:[%s676_s1 + $0x28] sm:$0xff]  ;;  %v158_v17 = vlaneseq }
   0xc   : > { %504 = vset.pattern.permute.xlu0 %v534_v1  ;;  %189 = vmatpush.msra.mxu0 %v147_v0  ;;  %s477_s13 = sshll.u32 %s679_s10, 3  ;;  %v144_v12 = vld [vmem:[%s676_s1 + $0x20] sm:$0xff]  ;;  %v143_v13 = vld [vmem:[%s676_s1 + $0x18] sm:$0xff]  ;;  %v142_v14 = vld [vmem:[%s676_s1 + $0x10] sm:$0xff]  ;;  %v536_v21 = vmov 0.0   ;;  %vm177_vm6 = vcmask 523264  }
   0xd   : > { %s134_s16 = scalar_lea.vmem %s675_s0, %s477_s13  ;;  %v141_v15 = vld [vmem:[%s676_s1 + $0x8] sm:$0xff]  ;;  %v140_v16 = vld [vmem:[%s676_s1] sm:$0xff]  ;;  %v599_v19 = vand.u32 127, %v158_v17  ;;  %v537_v57 = vmov -1.0   ;;  %vm241_vm12 = vcmask 261120   ;;  %v538_v0 = vmov 32.0   ;;  %s138_s26 = scalar_lea.vmem %s677_s2, %s477_s13 }
   0xe   : > { %v139_v2 = vld [vmem:[%s134_s16] sm:$0xff]  ;;  %190 = vmatpush.msra.mxu0 %v146_v10 }
   0xf   : > { %vm485_vm0 = vcmp.lt.s32.totalorder %v139_v2, 0  ;;  %v486_v3 = vceil.f32 %v139_v2  ;;  %v487_v4 = vfloor.f32 %v139_v2  ;;  %vm165_vm1 = vcmp.lt.s32.totalorder %v599_v19, 48  ;;  %v607_v24 = vld [vmem:[%s676_s1 + $0x80] sm:$0xff] }
  0x10   : > { %191 = vmatpush.msra.mxu0 %v145_v11  ;;  %v176_v25 = vperm.slane %v607_v24, 0 }
  0x11   : > { %v488_v5 = vsel %vm485_vm0, %v486_v3, %v487_v4 }
  0x12   : > { %v574_v6 = vcvt.f32.s32 %v488_v5  ;;  %192 = vmatpush.msra.mxu0 %v144_v12 }
  0x14   : > { %v160_v7 = vadd.s32 32, %v574_v6  ;;  %v167_v8 = vadd.s32 48, %v574_v6  ;;  %193 = vmatpush.msra.mxu0 %v143_v13  ;;  %v151_v13 = vld [vmem:[%s676_s1 + $0x58] sm:$0xff] }
  0x15   : > { %291 = vmatpush.msra.mxu1 %v151_v13 }
  0x16   : > { %162 = vperm.xlu0 %504, %v160_v7   ;;  %194 = vmatpush.msra.mxu0 %v142_v14  ;;  %v150_v14 = vld [vmem:[%s676_s1 + $0x50] sm:$0xff] }
  0x17   : > { %292 = vmatpush.msra.mxu1 %v150_v14 }
  0x18   : > { %195 = vmatpush.msra.mxu0 %v141_v15  ;;  %v149_v15 = vld [vmem:[%s676_s1 + $0x48] sm:$0xff] }
  0x19   : > { %293 = vmatpush.msra.mxu1 %v149_v15 }
  0x1a   : > { %196 = vmatpush.msra.mxu0 %v140_v16  ;;  %v148_v16 = vld [vmem:[%s676_s1 + $0x40] sm:$0xff] }
  0x1b   : > { %294 = vmatpush.msra.mxu1 %v148_v16  ;;  %v155_v16 = vld [vmem:[%s676_s1 + $0x78] sm:$0xff] }
  0x1c   : > { %378 = vmatpush.msra.mxu2 %v155_v16 }
  0x1e   : > { %505 = vset.pattern.permute.xlu0 %v535_v9 }
  0x1f   : > { %169 = vperm.xlu0 %505, %v167_v8  }
  0x88   : > { %v163_v18 = vpop.permute.xlu0 %162 }
  0x89   : > { %vm164_vm2 = vcmp.eq.s32.totalorder %v599_v19, %v163_v18 }
  0x8a   : > { %vm166_vm3 = vmand %vm164_vm2, %vm165_vm1 }
  0x91   : > { %v170_v20 = vpop.permute.xlu0 %169 }
  0x92   : > { %vm171_vm4 = vcmp.eq.s32.totalorder %v599_v19, %v170_v20 }
  0x93   : > { %vm172_vm5 = vmor %vm166_vm3, %vm171_vm4 }
  0x94   : > { %v479_v22 = vsel %vm172_vm5, 1.0, %v536_v21 }
  0x95   : > { %v175_v23 = vadd.f32 %v479_v22, %v139_v2 }
  0x97   : > { %480 = vmatmul.msk.f32.vlgmr.msra.gmra.mxu0 %vm177_vm6, %v175_v23 }
 0x114   : > { %v198_v26 = vpop.f32.mrf.mxu0 }
 0x115   : > { %v199_v27 = vadd.f32 %v198_v26, %v176_v25 }
 0x117   : > { %v202_v28 = vmul.f32 0.70710677, %v199_v27  ;;  %v201_v60 = vmul.f32 0.5, %v199_v27 }
 0x119   : > { %v205_v29 = vand.u32 2147483647, %v202_v28  ;;  %vm203_vm11 = vcmp.ge.f32.partialorder %v202_v28, 0.0  ;;  %v271_v28 = vperm.slane %v607_v24, 2 }
 0x11a   : > { %v204_v58 = vsel %vm203_vm11, 1.0, %v537_v57  ;;  %vm416_vm11 = vcmp.eq.s32.totalorder %v599_v19, 16 }
 0x11b   : > { %v206_v30 = vmul.f32 0.3275911, %v205_v29  ;;  %v232_v41 = vsub.f32 0.0, %v205_v29 }
 0x11d   : > { %v207_v31 = vadd.f32 1.0, %v206_v30  ;;  %v233_v45 = vmul.f32 %v232_v41, %v205_v29 }
 0x11f   : > { %508 = vrcp.f32 %v207_v31  ;;  %v219_v35 = vand.u32 2147483648, %v207_v31  ;;  %v217_v37 = vand.u32 2147483647, %v207_v31  ;;  %vm213_vm8 = vweird.f32 %v207_v31 }
 0x120   : > { %v234_v48 = vmul.f32 1.442695, %v233_v45 }
 0x121   : > { %v220_v39 = vor.u32 1.1754944e-38, %v219_v35  ;;  %vm218_vm10 = vcmp.eq.f32.partialorder %v217_v37, 8.507059e+37 }
 0x122   : > { %510 = vpow2.f32 %v234_v48 }
 0x123   : > { %512 = vrcp.f32 %v538_v0 }
 0x125   : > { %v509_v32 = vpop.eup %508 }
 0x126   : > { %v209_v33 = vmul.f32 %v509_v32, %v207_v31  ;;  %vm214_vm7 = vweird.f32 %v509_v32  ;;  %v273_v31 = vperm.slane %v607_v24, 3 }
 0x127   : > { %vm215_vm9 = vmor %vm213_vm8, %vm214_vm7 }
 0x128   : > { %v210_v34 = vsub.f32 1.0, %v209_v33  ;;  %v511_v54 = vpop.eup %510 }
 0x129   : > { %v513_v1 = vpop.eup %512 }
 0x12a   : > { %v211_v36 = vmul.f32 %v509_v32, %v210_v34  ;;  %v246_v2 = vmul.f32 32.0, %v513_v1  ;;  %vm250_vm13 = vweird.f32 %v513_v1  ;;  %v275_v34 = vperm.slane %v607_v24, 1 }
 0x12c   : > { %v212_v38 = vadd.f32 %v509_v32, %v211_v36  ;;  %v247_v3 = vsub.f32 1.0, %v246_v2 }
 0x12e   : > { %v216_v40 = vsel %vm215_vm9, %v509_v32, %v212_v38  ;;  %v248_v4 = vmul.f32 %v513_v1, %v247_v3  ;;  %vm386_vm9 = vcmp.lt.s32.totalorder %v599_v19, 16 }
 0x12f   : > { %v221_v42 = vsel %vm218_vm10, %v220_v39, %v216_v40 }
 0x130   : > { %v223_v43 = vmul.f32 1.0614054, %v221_v42  ;;  %v249_v5 = vadd.f32 %v513_v1, %v248_v4 }
 0x132   : > { %v224_v44 = vadd.f32 -1.4531521, %v223_v43  ;;  %v612_v7 = vsel %vm250_vm13, %v513_v1, %v249_v5 }
 0x134   : > { %v225_v46 = vmul.f32 %v224_v44, %v221_v42 }
 0x136   : > { %v226_v47 = vadd.f32 1.4214138, %v225_v46 }
 0x138   : > { %v227_v49 = vmul.f32 %v226_v47, %v221_v42 }
 0x13a   : > { %v228_v50 = vadd.f32 -0.28449672, %v227_v49 }
 0x13c   : > { %v229_v51 = vmul.f32 %v228_v50, %v221_v42 }
 0x13e   : > { %v230_v52 = vadd.f32 0.2548296, %v229_v51 }
 0x140   : > { %v231_v53 = vmul.f32 %v230_v52, %v221_v42 }
 0x142   : > { %v236_v55 = vmul.f32 %v511_v54, %v231_v53 }
 0x144   : > { %v237_v56 = vsub.f32 1.0, %v236_v55 }
 0x146   : > { %v238_v59 = vmul.f32 %v237_v56, %v204_v58 }
 0x148   : > { %v239_v61 = vadd.f32 1.0, %v238_v59 }
 0x14a   : > { %v240_v62 = vmul.f32 %v239_v61, %v201_v60 }
 0x14c   : > { %v242_v63 = vsel %vm241_vm12, %v240_v62, 0.0 }
 0x14d   : > { %243 = vadd.xlane.f32.xlu1 %v242_v63 }
 0x1c0   : > { %v244_v8 = vpop.xlane.xlu1 %243 }
 0x1c1   : > { %v252_v9 = vmul.f32 %v612_v7, %v244_v8 }
 0x1c3   : > { %v253_v10 = vsub.f32 %v240_v62, %v252_v9 }
 0x1c5   : > { %v254_v11 = vmul.f32 %v253_v10, %v253_v10 }
 0x1c7   : > { %v255_v12 = vsel %vm241_vm12, %v254_v11, 0.0 }
 0x1c8   : > { %256 = vadd.xlane.f32.xlu1 %v255_v12 }
 0x23b   : > { %v257_v17 = vpop.xlane.xlu1 %256 }
 0x23c   : > { %v258_v18 = vmul.f32 %v257_v17, %v612_v7  ;;  %v153_v17 = vld [vmem:[%s676_s1 + $0x68] sm:$0xff] }
 0x23e   : > { %v259_v20 = vadd.f32 1e-05, %v258_v18  ;;  %v152_v18 = vld [vmem:[%s676_s1 + $0x60] sm:$0xff] }
 0x240   : > { %514 = vrsqrt.f32 %v259_v20  ;;  %vm266_vm15 = vweird.f32 %v259_v20 }
 0x246   : > { %v515_v21 = vpop.eup %514 }
 0x247   : > { %v261_v22 = vmul.f32 %v515_v21, %v259_v20  ;;  %vm267_vm14 = vweird.f32 %v515_v21  ;;  %v539_v20 = vmov 66  }
 0x248   : > { %vm268_vm0 = vmor %vm266_vm15, %vm267_vm14  ;;  %506 = vset.pattern.permute.xlu2 %v539_v20  ;;  %507 = vset.pattern.permute.xlu0 %v539_v20 }
 0x249   : > { %v262_v23 = vmul.f32 %v515_v21, %v261_v22 }
 0x24b   : > { %v263_v25 = vmul.f32 0.5, %v262_v23 }
 0x24d   : > { %v264_v26 = vsub.f32 1.5, %v263_v25 }
 0x24f   : > { %v265_v27 = vmul.f32 %v515_v21, %v264_v26 }
 0x251   : > { %v269_v29 = vsel %vm268_vm0, %v515_v21, %v265_v27 }
 0x252   : > { %v270_v30 = vmul.f32 %v269_v29, %v253_v10 }
 0x254   : > { %v272_v32 = vmul.f32 %v271_v28, %v270_v30 }
 0x256   : > { %v274_v33 = vadd.f32 %v273_v31, %v272_v32 }
 0x258   : > { %481 = vmatmul.msk.f32.vlgmr.msra.gmra.mxu1 %vm241_vm12, %v274_v33 }
 0x2d5   : > { %v296_v35 = vpop.f32.mrf.mxu1 }
 0x2d6   : > { %v297_v36 = vadd.f32 %v296_v35, %v275_v34 }
 0x2d8   : > { %v300_v37 = vmul.f32 0.70710677, %v297_v36  ;;  %v299_v5 = vmul.f32 0.5, %v297_v36 }
 0x2da   : > { %v303_v38 = vand.u32 2147483647, %v300_v37  ;;  %vm301_vm5 = vcmp.ge.f32.partialorder %v300_v37, 0.0 }
 0x2db   : > { %v302_v3 = vsel %vm301_vm5, 1.0, %v537_v57  ;;  %v154_v57 = vld [vmem:[%s676_s1 + $0x70] sm:$0xff] }
 0x2dc   : > { %v304_v39 = vmul.f32 0.3275911, %v303_v38  ;;  %v330_v50 = vsub.f32 0.0, %v303_v38  ;;  %379 = vmatpush.msra.mxu2 %v154_v57 }
 0x2de   : > { %v305_v40 = vadd.f32 1.0, %v304_v39  ;;  %v331_v54 = vmul.f32 %v330_v50, %v303_v38  ;;  %380 = vmatpush.msra.mxu2 %v153_v17 }
 0x2e0   : > { %516 = vrcp.f32 %v305_v40  ;;  %v317_v44 = vand.u32 2147483648, %v305_v40  ;;  %v315_v46 = vand.u32 2147483647, %v305_v40  ;;  %vm311_vm2 = vweird.f32 %v305_v40  ;;  %381 = vmatpush.msra.mxu2 %v152_v18 }
 0x2e1   : > { %v332_v58 = vmul.f32 1.442695, %v331_v54 }
 0x2e2   : > { %v318_v48 = vor.u32 1.1754944e-38, %v317_v44  ;;  %vm316_vm4 = vcmp.eq.f32.partialorder %v315_v46, 8.507059e+37 }
 0x2e3   : > { %518 = vpow2.f32 %v332_v58 }
 0x2e6   : > { %v517_v41 = vpop.eup %516 }
 0x2e7   : > { %v307_v42 = vmul.f32 %v517_v41, %v305_v40  ;;  %vm312_vm1 = vweird.f32 %v517_v41 }
 0x2e8   : > { %vm313_vm3 = vmor %vm311_vm2, %vm312_vm1 }
 0x2e9   : > { %v308_v43 = vsub.f32 1.0, %v307_v42  ;;  %v519_v0 = vpop.eup %518 }
 0x2eb   : > { %v309_v45 = vmul.f32 %v517_v41, %v308_v43 }
 0x2ed   : > { %v310_v47 = vadd.f32 %v517_v41, %v309_v45 }
 0x2ef   : > { %v314_v49 = vsel %vm313_vm3, %v517_v41, %v310_v47 }
 0x2f0   : > { %v319_v51 = vsel %vm316_vm4, %v318_v48, %v314_v49 }
 0x2f1   : > { %v321_v52 = vmul.f32 1.0614054, %v319_v51 }
 0x2f3   : > { %v322_v53 = vadd.f32 -1.4531521, %v321_v52 }
 0x2f5   : > { %v323_v55 = vmul.f32 %v322_v53, %v319_v51 }
 0x2f7   : > { %v324_v56 = vadd.f32 1.4214138, %v323_v55 }
 0x2f9   : > { %v325_v59 = vmul.f32 %v324_v56, %v319_v51 }
 0x2fb   : > { %v326_v60 = vadd.f32 -0.28449672, %v325_v59 }
 0x2fd   : > { %v327_v61 = vmul.f32 %v326_v60, %v319_v51 }
 0x2ff   : > { %v328_v62 = vadd.f32 0.2548296, %v327_v61 }
 0x301   : > { %v329_v63 = vmul.f32 %v328_v62, %v319_v51 }
 0x303   : > { %v334_v1 = vmul.f32 %v519_v0, %v329_v63 }
 0x305   : > { %v335_v2 = vsub.f32 1.0, %v334_v1 }
 0x307   : > { %v336_v4 = vmul.f32 %v335_v2, %v302_v3 }
 0x309   : > { %v337_v8 = vadd.f32 1.0, %v336_v4 }
 0x30b   : > { %v338_v9 = vmul.f32 %v337_v8, %v299_v5 }
 0x30d   : > { %v339_v10 = vsel %vm241_vm12, %v338_v9, 0.0 }
 0x30e   : > { %340 = vadd.xlane.f32.xlu2 %v339_v10 }
 0x381   : > { %v341_v11 = vpop.xlane.xlu2 %340 }
 0x382   : > { %v342_v12 = vmul.f32 %v341_v11, %v612_v7 }
 0x384   : > { %v343_v13 = vsub.f32 %v338_v9, %v342_v12 }
 0x386   : > { %v344_v14 = vmul.f32 %v343_v13, %v343_v13 }
 0x388   : > { %v345_v15 = vsel %vm241_vm12, %v344_v14, 0.0 }
 0x389   : > { %346 = vadd.xlane.f32.xlu2 %v345_v15 }
 0x3a1   : > { %401 = vperm.xlu2 %506, %v574_v6  }
 0x3fc   : > { %v347_v21 = vpop.xlane.xlu2 %346 }
 0x3fd   : > { %v348_v22 = vmul.f32 %v347_v21, %v612_v7 }
 0x3ff   : > { %v349_v23 = vadd.f32 1e-05, %v348_v22 }
 0x401   : > { %520 = vrsqrt.f32 %v349_v23  ;;  %vm356_vm7 = vweird.f32 %v349_v23 }
 0x404   : > { %v402_v36 = vpop.permute.xlu2 %401 }
 0x405   : > { %vm403_vm10 = vcmp.eq.s32.totalorder %v599_v19, %v402_v36 }
 0x407   : > { %v521_v25 = vpop.eup %520 }
 0x408   : > { %v351_v26 = vmul.f32 %v521_v25, %v349_v23  ;;  %vm357_vm6 = vweird.f32 %v521_v25 }
 0x409   : > { %vm358_vm8 = vmor %vm356_vm7, %vm357_vm6 }
 0x40a   : > { %v352_v27 = vmul.f32 %v521_v25, %v351_v26 }
 0x40c   : > { %v353_v29 = vmul.f32 0.5, %v352_v27 }
 0x40e   : > { %v354_v30 = vsub.f32 1.5, %v353_v29 }
 0x410   : > { %v355_v32 = vmul.f32 %v521_v25, %v354_v30 }
 0x412   : > { %v359_v33 = vsel %vm358_vm8, %v521_v25, %v355_v32 }
 0x413   : > { %v360_v34 = vmul.f32 %v359_v33, %v343_v13 }
 0x415   : > { %v361_v35 = vmul.f32 %v360_v34, %v271_v28 }
 0x417   : > { %v362_v6 = vadd.f32 %v361_v35, %v273_v31 }
 0x419   : > { %482 = vmatmul.msk.f32.vlgmr.msra.gmra.mxu2 %vm241_vm12, %v362_v6 }
 0x49c   : > { %v383_v7 = vpop.f32.mrf.mxu2 }
 0x49d   : > { %v387_v37 = vsel %vm386_vm9, %v383_v7, -1e+30  ;;  %v404_v39 = vsel %vm403_vm10, %v383_v7, 0.0 }
 0x49e   : > { %v388_v38 = vsel %vm241_vm12, %v387_v37, -inf  ;;  %v405_v40 = vsel %vm241_vm12, %v404_v39, 0.0 }
 0x49f   : > { %389 = vmax.xlane.f32.xlu1 %v388_v38 }
 0x4a7   : > { %406 = vadd.xlane.f32.xlu1 %v405_v40 }
 0x512   : > { %v390_v28 = vpop.xlane.xlu1 %389 }
 0x513   : > { %v391_v41 = vsub.f32 %v387_v37, %v390_v28 }
 0x515   : > { %v392_v24 = vmul.f32 1.442695, %v391_v41 }
 0x517   : > { %522 = vpow2.f32 %v392_v24 }
 0x51a   : > { %v407_v47 = vpop.xlane.xlu1 %406 }
 0x51d   : > { %v523_v31 = vpop.eup %522 }
 0x51e   : > { %v394_v42 = vsel %vm241_vm12, %v523_v31, 0.0 }
 0x51f   : > { %395 = vadd.xlane.f32.xlu0 %v394_v42 }
 0x592   : > { %v396_v43 = vpop.xlane.xlu0 %395 }
 0x593   : > { %524 = vlog2.f32 %v396_v43 }
 0x599   : > { %v525_v44 = vpop.eup %524 }
 0x59a   : > { %v398_v45 = vmul.f32 0.6931472, %v525_v44 }
 0x59c   : > { %v399_v46 = vadd.f32 %v398_v45, %v390_v28 }
 0x59e   : > { %v408_v48 = vsub.f32 %v399_v46, %v407_v47 }
 0x5a0   : > { %v409_v49 = vrot.slane %v408_v48, 4 }
 0x5a2   : > { %v410_v50 = vadd.f32 %v409_v49, %v408_v48 }
 0x5a4   : > { %v411_v51 = vrot.slane %v410_v50, 2 }
 0x5a6   : > { %v412_v52 = vadd.f32 %v411_v51, %v410_v50 }
 0x5a8   : > { %v413_v53 = vrot.slane %v412_v52, 1 }
 0x5aa   : > { %v414_v54 = vadd.f32 %v413_v53, %v412_v52 }
 0x5ac   : > { %v415_v55 = vmul.f32 0.125, %v414_v54 }
 0x5ae   : > { %v417_v56 = vsel %vm416_vm11, %v415_v55, %v383_v7 }
 0x5af   : > { %418 = vst.msk [vmem:[%s138_s26] sm:$0xff] %vm241_vm12, %v417_v56 }
 0x5b0 PF: > { %s12_s9 = sadd.s32 1, %s532_s9  }
 0x5b1   : > { %p9_p4 = scmp.ge.s32.totalorder %s12_s9, 6  }
 0x5b3   :  { %11 = sbr.rel (!%p9_p4) target bundleno = 1 (0x1), region = 58 }

</bundles_post_ra>
